<compile_context>
chip_gen: v5e
topology: v5e:2x2
jax: 0.10.0
libtpu: 0.0.40
codegen_flags: <defaults>
</compile_context>

<pallas_src>
import functools

import jax
import jax.numpy as jnp
from jax.experimental import pallas as pl
from jax.experimental.pallas import tpu as pltpu


def _ff_res_kernel(x_ref, gamma_ref, beta_ref, w_ref, b_ref, o_ref, *, eps):
    # x_ref:     (tm, D)  rows of the flattened input
    # gamma_ref: (1, D)   LayerNorm scale
    # beta_ref:  (1, D)   LayerNorm shift
    # w_ref:     (D, D)   Linear weight, stored as (in, out)
    # b_ref:     (1, D)   Linear bias
    # o_ref:     (tm, D)  output rows
    x = x_ref[...].astype(jnp.float32)

    # --- LayerNorm over the feature (lane) axis ---
    mean = jnp.mean(x, axis=-1, keepdims=True)
    xc = x - mean
    var = jnp.mean(xc * xc, axis=-1, keepdims=True)
    xn = xc * jax.lax.rsqrt(var + eps)
    xn = xn * gamma_ref[...] + beta_ref[...]

    # --- Linear on the MXU with f32 accumulation ---
    h = jnp.dot(xn.astype(w_ref.dtype), w_ref[...],
                preferred_element_type=jnp.float32) + b_ref[...]

    # --- GELU (tanh approximation; EUP-friendly) ---
    # TODO(synk): torch nn.GELU() default is exact-erf GELU; tanh approx used here.
    h = jax.nn.gelu(h, approximate=True)

    # --- Dropout is identity at inference ---
    # TODO(synk): training-mode dropout (pltpu.prng_seed/prng_random_bits) not implemented.

    # --- Residual add with the pre-norm input ---
    o_ref[...] = (h + x).astype(o_ref.dtype)


def ff_res_layer(x, gamma, beta, w, b, *, eps=1e-5, block_m=256):
    """FFResLayer forward (eval mode): GELU(LayerNorm(x) @ w + b) + x.

    Args:
      x:     (..., D) input
      gamma: (D,) LayerNorm weight
      beta:  (D,) LayerNorm bias
      w:     (D, D) Linear weight, already transposed to (in, out)
      b:     (D,)  Linear bias
    Returns:
      array with the same shape as x.
    """
    orig_shape = x.shape
    D = orig_shape[-1]
    x2 = x.reshape(-1, D)
    B = x2.shape[0]

    # Row tile: biggest single block for small inputs, bounded (and a multiple
    # of the 8-sublane tile) for large ones.
    tm = B if B <= block_m else block_m
    Bp = ((B + tm - 1) // tm) * tm
    if Bp != B:
        x2 = jnp.pad(x2, ((0, Bp - B), (0, 0)))  # padded rows dropped afterwards

    gamma2 = gamma.reshape(1, D)
    beta2 = beta.reshape(1, D)
    b2 = b.reshape(1, D)

    out = pl.pallas_call(
        functools.partial(_ff_res_kernel, eps=eps),
        out_shape=jax.ShapeDtypeStruct((Bp, D), x.dtype),
        grid_spec=pltpu.PrefetchScalarGridSpec(
            num_scalar_prefetch=0,
            grid=(Bp // tm,),
            in_specs=[
                pl.BlockSpec((tm, D), lambda i: (i, 0)),   # x rows (streamed)
                pl.BlockSpec((1, D), lambda i: (0, 0)),    # gamma  (resident)
                pl.BlockSpec((1, D), lambda i: (0, 0)),    # beta   (resident)
                pl.BlockSpec((D, D), lambda i: (0, 0)),    # weight (resident)
                pl.BlockSpec((1, D), lambda i: (0, 0)),    # bias   (resident)
            ],
            out_specs=pl.BlockSpec((tm, D), lambda i: (i, 0)),
        ),
        compiler_params=pltpu.CompilerParams(
            dimension_semantics=("parallel",),
        ),
    )(x2, gamma2, beta2, w, b2)

    return out[:B].reshape(orig_shape)


if __name__ == "__main__":
    # Small deterministic shapes consistent with FFResLayer: (batch, seq, in_dim)
    batch, seq, in_dim = 2, 8, 32

    key = jax.random.PRNGKey(0)
    kx, kw, kb, kg, kbe = jax.random.split(key, 5)

    x = jax.random.normal(kx, (batch, seq, in_dim), dtype=jnp.float32)
    # torch Linear weight is (out, in); we store it transposed as (in, out).
    w = jax.random.normal(kw, (in_dim, in_dim), dtype=jnp.float32) * 0.1
    b = jax.random.normal(kb, (in_dim,), dtype=jnp.float32) * 0.1
    gamma = 1.0 + 0.1 * jax.random.normal(kg, (in_dim,), dtype=jnp.float32)
    beta = 0.1 * jax.random.normal(kbe, (in_dim,), dtype=jnp.float32)

    out = ff_res_layer(x, gamma, beta, w, b)
    out = jax.block_until_ready(out)

    # Pure-JAX reference (eval mode: dropout = identity), same GELU variant.
    def ref(xv):
        mean = xv.mean(-1, keepdims=True)
        var = ((xv - mean) ** 2).mean(-1, keepdims=True)
        xn = (xv - mean) * jax.lax.rsqrt(var + 1e-5) * gamma + beta
        h = xn @ w + b
        return jax.nn.gelu(h, approximate=True) + xv

    r = ref(x)
    assert out.shape == x.shape
    assert jnp.allclose(out, r, atol=1e-4, rtol=1e-4), float(jnp.max(jnp.abs(out - r)))

    print("KERNEL_OK")
</pallas_src>

<mosaic_0001>
module attributes {stable_mosaic.version = 11 : i64} {
  func.func @_ff_res_kernel(%arg0: i32, %arg1: memref<16x32xf32, #tpu.memory_space<vmem>>, %arg2: memref<1x32xf32, #tpu.memory_space<vmem>>, %arg3: memref<1x32xf32, #tpu.memory_space<vmem>>, %arg4: memref<32x32xf32, #tpu.memory_space<vmem>>, %arg5: memref<1x32xf32, #tpu.memory_space<vmem>>, %arg6: memref<16x32xf32, #tpu.memory_space<vmem>>) attributes {dimension_semantics = [#tpu.dimension_semantics<parallel>], iteration_bounds = array<i64: 1>, scalar_prefetch = 0 : i64, scratch_operands = 0 : i64, tpu.core_type = #tpu.core_type<tc>, window_params = [{transform_indices = @transform_0, window_bounds = array<i64: 16, 32>}, {pipeline_mode = #tpu.pipeline_mode<synchronous>, transform_indices = @transform_1, window_bounds = array<i64: 1, 32>}, {pipeline_mode = #tpu.pipeline_mode<synchronous>, transform_indices = @transform_2, window_bounds = array<i64: 1, 32>}, {pipeline_mode = #tpu.pipeline_mode<synchronous>, transform_indices = @transform_3, window_bounds = array<i64: 32, 32>}, {pipeline_mode = #tpu.pipeline_mode<synchronous>, transform_indices = @transform_4, window_bounds = array<i64: 1, 32>}, {transform_indices = @transform_5, window_bounds = array<i64: 16, 32>}]} {
    %c0 = arith.constant 0 : index
    %c0_0 = arith.constant 0 : index
    %0 = vector.load %arg1[%c0, %c0_0] : memref<16x32xf32, #tpu.memory_space<vmem>>, vector<16x32xf32>
    %cst = arith.constant dense<0.000000e+00> : vector<16xf32>
    %1 = vector.multi_reduction <add>, %0, %cst [1] : vector<16x32xf32> to vector<16xf32>
    %2 = vector.shape_cast %1 : vector<16xf32> to vector<16x1xf32>
    %cst_1 = arith.constant 3.200000e+01 : f32
    %3 = vector.broadcast %cst_1 : f32 to vector<16x1xf32>
    %4 = arith.divf %2, %3 : vector<16x1xf32>
    %5 = vector.broadcast %4 : vector<16x1xf32> to vector<16x32xf32>
    %6 = arith.subf %0, %5 : vector<16x32xf32>
    %7 = arith.mulf %6, %6 : vector<16x32xf32>
    %cst_2 = arith.constant dense<0.000000e+00> : vector<16xf32>
    %8 = vector.multi_reduction <add>, %7, %cst_2 [1] : vector<16x32xf32> to vector<16xf32>
    %9 = vector.shape_cast %8 : vector<16xf32> to vector<16x1xf32>
    %cst_3 = arith.constant 3.200000e+01 : f32
    %10 = vector.broadcast %cst_3 : f32 to vector<16x1xf32>
    %11 = arith.divf %9, %10 : vector<16x1xf32>
    %cst_4 = arith.constant 9.99999974E-6 : f32
    %12 = vector.broadcast %cst_4 : f32 to vector<16x1xf32>
    %13 = arith.addf %11, %12 : vector<16x1xf32>
    %14 = math.rsqrt %13 : vector<16x1xf32>
    %15 = vector.broadcast %14 : vector<16x1xf32> to vector<16x32xf32>
    %16 = arith.mulf %6, %15 : vector<16x32xf32>
    %c0_5 = arith.constant 0 : index
    %c0_6 = arith.constant 0 : index
    %17 = vector.load %arg2[%c0_5, %c0_6] : memref<1x32xf32, #tpu.memory_space<vmem>>, vector<1x32xf32>
    %18 = vector.broadcast %17 : vector<1x32xf32> to vector<16x32xf32>
    %19 = arith.mulf %16, %18 : vector<16x32xf32>
    %c0_7 = arith.constant 0 : index
    %c0_8 = arith.constant 0 : index
    %20 = vector.load %arg3[%c0_7, %c0_8] : memref<1x32xf32, #tpu.memory_space<vmem>>, vector<1x32xf32>
    %21 = vector.broadcast %20 : vector<1x32xf32> to vector<16x32xf32>
    %22 = arith.addf %19, %21 : vector<16x32xf32>
    %c0_9 = arith.constant 0 : index
    %c0_10 = arith.constant 0 : index
    %23 = vector.load %arg4[%c0_9, %c0_10] : memref<32x32xf32, #tpu.memory_space<vmem>>, vector<32x32xf32>
    %cst_11 = arith.constant dense<0.000000e+00> : vector<16x32xf32>
    %24 = tpu.matmul %22, %23, %cst_11 {dimension_numbers = #tpu.dot_dimension_numbers<[1], [0], [0], [1], [0, 0, 1, 1], [], []>} : vector<16x32xf32>, vector<32x32xf32>, vector<16x32xf32> -> vector<16x32xf32>
    %c0_12 = arith.constant 0 : index
    %c0_13 = arith.constant 0 : index
    %25 = vector.load %arg5[%c0_12, %c0_13] : memref<1x32xf32, #tpu.memory_space<vmem>>, vector<1x32xf32>
    %26 = vector.broadcast %25 : vector<1x32xf32> to vector<16x32xf32>
    %27 = arith.addf %24, %26 : vector<16x32xf32>
    %28 = arith.mulf %27, %27 : vector<16x32xf32>
    %29 = arith.mulf %27, %28 : vector<16x32xf32>
    %cst_14 = arith.constant 4.471500e-02 : f32
    %30 = vector.broadcast %cst_14 : f32 to vector<16x32xf32>
    %31 = arith.mulf %30, %29 : vector<16x32xf32>
    %32 = arith.addf %27, %31 : vector<16x32xf32>
    %cst_15 = arith.constant 0.797884583 : f32
    %33 = vector.broadcast %cst_15 : f32 to vector<16x32xf32>
    %34 = arith.mulf %33, %32 : vector<16x32xf32>
    %35 = math.tanh %34 : vector<16x32xf32>
    %cst_16 = arith.constant 1.000000e+00 : f32
    %36 = vector.broadcast %cst_16 : f32 to vector<16x32xf32>
    %37 = arith.addf %36, %35 : vector<16x32xf32>
    %cst_17 = arith.constant 5.000000e-01 : f32
    %38 = vector.broadcast %cst_17 : f32 to vector<16x32xf32>
    %39 = arith.mulf %38, %37 : vector<16x32xf32>
    %40 = arith.mulf %27, %39 : vector<16x32xf32>
    %41 = arith.addf %40, %0 : vector<16x32xf32>
    %c0_18 = arith.constant 0 : index
    %c0_19 = arith.constant 0 : index
    %42 = vector.load %arg6[%c0_18, %c0_19] : memref<16x32xf32, #tpu.memory_space<vmem>>, vector<16x32xf32>
    tpu.vector_store %arg6[%c0_18, %c0_19], %41 {strides = array<i32>} : memref<16x32xf32, #tpu.memory_space<vmem>>, vector<16x32xf32>,
    return
  }
  func.func @transform_0(%arg0: i32) -> (i32, i32) {
    %c0_i32 = arith.constant 0 : i32
    %c0_i32_0 = arith.constant 0 : i32
    return %arg0, %c0_i32 : i32, i32
  }
  func.func @transform_1(%arg0: i32) -> (i32, i32) {
    %c0_i32 = arith.constant 0 : i32
    %c0_i32_0 = arith.constant 0 : i32
    %c0_i32_1 = arith.constant 0 : i32
    return %c0_i32, %c0_i32_0 : i32, i32
  }
  func.func @transform_2(%arg0: i32) -> (i32, i32) {
    %c0_i32 = arith.constant 0 : i32
    %c0_i32_0 = arith.constant 0 : i32
    %c0_i32_1 = arith.constant 0 : i32
    return %c0_i32, %c0_i32_0 : i32, i32
  }
  func.func @transform_3(%arg0: i32) -> (i32, i32) {
    %c0_i32 = arith.constant 0 : i32
    %c0_i32_0 = arith.constant 0 : i32
    %c0_i32_1 = arith.constant 0 : i32
    return %c0_i32, %c0_i32_0 : i32, i32
  }
  func.func @transform_4(%arg0: i32) -> (i32, i32) {
    %c0_i32 = arith.constant 0 : i32
    %c0_i32_0 = arith.constant 0 : i32
    %c0_i32_1 = arith.constant 0 : i32
    return %c0_i32, %c0_i32_0 : i32, i32
  }
  func.func @transform_5(%arg0: i32) -> (i32, i32) {
    %c0_i32 = arith.constant 0 : i32
    %c0_i32_0 = arith.constant 0 : i32
    return %arg0, %c0_i32 : i32, i32
  }
}

</mosaic_0001>

<bundles_post_ra>
// kernel: tpu_custom_call.1
= control target key start
LH: loop header
LB: loop body
LE: loop exit
PB: predicated region body
PF: predicated region fallthrough
CT: control target
= control target key end

     0   :  { %10 = vsyncpa [#allocation3], 0  ;;  %s421_s0 = inlined_call_operand.hbm [shape: f32[16,32], index: 0, kind: input, shape index: {}]   ;;  %s422_s1 = inlined_call_operand.hbm [shape: f32[1,32], index: 1, kind: input, shape index: {}]   ;;  %s423_s2 = inlined_call_operand.vmem [shape: f32[1,32], index: 2, kind: input, shape index: {}]   ;;  %s424_s3 = inlined_call_operand.hbm [shape: f32[32,32], index: 3, kind: input, shape index: {}]   ;;  %s425_s4 = inlined_call_operand.vmem [shape: f32[1,32], index: 4, kind: input, shape index: {}]   ;;  %s426_s5 = inlined_call_operand.hbm [shape: f32[16,32], index: 5, kind: output, shape index: {}]  }
   0x1   :  { %11 = vsyncpa [#allocation6], 0  ;;  %s31_s20 = sshll.u32 %s422_s1, 4  ;;  %s32_s20 = int_to_ptr.hbm [resolvable:$true] %s31_s20 }
   0x2   :  { %12 = vsyncpa [#allocation4], 0  ;;  %s339_s21 = smov [#allocation5]   ;;  %s17_s25 = sshll.u32 %s421_s0, 4  ;;  %s18_s25 = int_to_ptr.hbm [resolvable:$true] %s17_s25 }
   0x3   :  { %s33_s22 = sshll.u32 %s339_s21, 4  ;;  %s340_s26 = smov [#allocation2]   ;;  %s34_s22 = int_to_ptr.vmem [resolvable:$true] %s33_s22 }
   0x4   :  { %36 = dma.hbm_to_vmem [thread:$0]  %s32_s20, 16, %s34_s22, [#allocation6]  }
   0x5   :  { %s19_s27 = sshll.u32 %s340_s26, 4  ;;  %s341_s28 = smov 128   ;;  %s20_s27 = int_to_ptr.vmem [resolvable:$true] %s19_s27 }
   0x6   :  { %s342_s29 = smov 8   ;;  %s43_s6 = sshll.u32 %s424_s3, 4  ;;  %s44_s6 = int_to_ptr.hbm [resolvable:$true] %s43_s6 }
   0x7   :  { %25 = dma.hbm_to_vmem [thread:$0]  %s18_s25, 256, %s20_s27, [#allocation3], %s341_s28, %s341_s28, %s342_s29  }
   0x8   :  { %s343_s7 = smov [#allocation7]  }
   0x9   :  { %s45_s8 = sshll.u32 %s343_s7, 4  ;;  %s46_s8 = int_to_ptr.vmem [resolvable:$true] %s45_s8 }
   0xa   :  { %51 = dma.hbm_to_vmem [thread:$0]  %s44_s6, 512, %s46_s8, [#allocation6], %s341_s28, %s341_s28, %s342_s29  }
   0xb   :  { %333 = dma.done.wait [#allocation3], 256  }
   0xc   :  { %334 = vsyncadd [#allocation3], 4294967040 }
   0xd   :  { %335 = dma.done.wait [#allocation6], 528  }
   0xe   :  { %336 = vsyncadd [#allocation6], 4294966768  ;;  %vm68_vm0 = vcmask 261120   ;;  %v391_v0 = vld [vmem:[#allocation2] sm:$0xff]  ;;  %v395_v2 = vld [vmem:[#allocation2 + $0x8] sm:$0xff]  ;;  %v344_v4 = vmov 32.0  }
   0xf   :  { %v69_v1 = vsel %vm68_vm0, %v391_v0, 0.0  ;;  %v72_v3 = vsel %vm68_vm0, %v395_v2, 0.0  ;;  %227 = vrcp.f32 %v344_v4  ;;  %v135_v21 = vld [vmem:[#allocation7 + $0x18] sm:$0xff]  ;;  %v134_v22 = vld [vmem:[#allocation7 + $0x10] sm:$0xff]  ;;  %v133_v23 = vld [vmem:[#allocation7 + $0x8] sm:$0xff]  ;;  %s197_s13 = sshll.u32 %s426_s5, 4  ;;  %s198_s13 = int_to_ptr.hbm [resolvable:$true] %s197_s13 }
  0x10   :  { %70 = vadd.xlane.f32.xlu0 %v69_v1  ;;  %158 = vmatpush.msra.mxu0 %v135_v21  ;;  %v132_v24 = vld [vmem:[#allocation7] sm:$0xff]  ;;  %v224_v39 = vld [vmem:[#allocation5] ss:$0 sm:$0xff]  ;;  %v225_v43 = vld [vmem:[%s423_s2] ss:$0 sm:$0xff]  ;;  %s345_s2 = smov [#allocation8]  }
  0x11   :  { %213 = vmatpush.msra.mxu1 %v135_v21  ;;  %v226_v53 = vld [vmem:[%s425_s4] ss:$0 sm:$0xff]  ;;  %s195_s4 = sshll.u32 %s345_s2, 4  ;;  %s196_s4 = int_to_ptr.vmem [resolvable:$true] %s195_s4 }
  0x12   :  { %159 = vmatpush.msra.mxu0 %v134_v22 }
  0x13   :  { %214 = vmatpush.msra.mxu1 %v134_v22 }
  0x14   :  { %160 = vmatpush.msra.mxu0 %v133_v23 }
  0x15   :  { %v228_v5 = vpop.eup %227  ;;  %215 = vmatpush.msra.mxu1 %v133_v23 }
  0x16   :  { %v76_v6 = vmul.f32 32.0, %v228_v5  ;;  %vm80_vm1 = vweird.f32 %v228_v5  ;;  %161 = vmatpush.msra.mxu0 %v132_v24 }
  0x17   :  { %216 = vmatpush.msra.mxu1 %v132_v24 }
  0x18   :  { %73 = vadd.xlane.f32.xlu0 %v72_v3  ;;  %v77_v7 = vsub.f32 1.0, %v76_v6 }
  0x1a   :  { %v78_v8 = vmul.f32 %v228_v5, %v77_v7 }
  0x1c   :  { %v79_v9 = vadd.f32 %v228_v5, %v78_v8 }
  0x1e   :  { %v81_v10 = vsel %vm80_vm1, %v228_v5, %v79_v9 }
  0x83   :  { %v71_v11 = vpop.xlane.xlu0 %70 }
  0x84   :  { %v82_v12 = vmul.f32 %v81_v10, %v71_v11 }
  0x86   :  { %v84_v13 = vsub.f32 %v391_v0, %v82_v12 }
  0x88   :  { %v86_v14 = vmul.f32 %v84_v13, %v84_v13 }
  0x8a   :  { %v88_v15 = vsel %vm68_vm0, %v86_v14, 0.0 }
  0x8b   :  { %89 = vadd.xlane.f32.xlu1 %v88_v15  ;;  %v74_v16 = vpop.xlane.xlu0 %73 }
  0x8c   :  { %v83_v17 = vmul.f32 %v81_v10, %v74_v16 }
  0x8e   :  { %v85_v18 = vsub.f32 %v395_v2, %v83_v17 }
  0x90   :  { %v87_v19 = vmul.f32 %v85_v18, %v85_v18 }
  0x92   :  { %v91_v20 = vsel %vm68_vm0, %v87_v19, 0.0 }
  0x93   :  { %92 = vadd.xlane.f32.xlu1 %v91_v20 }
  0xfe   :  { %v90_v25 = vpop.xlane.xlu1 %89 }
  0xff   :  { %v94_v26 = vmul.f32 %v90_v25, %v81_v10 }
 0x101   :  { %v96_v27 = vadd.f32 1e-05, %v94_v26 }
 0x103   :  { %229 = vrsqrt.f32 %v96_v27  ;;  %vm104_vm3 = vweird.f32 %v96_v27 }
 0x106   :  { %v93_v28 = vpop.xlane.xlu1 %92 }
 0x107   :  { %v95_v29 = vmul.f32 %v93_v28, %v81_v10 }
 0x109   :  { %v230_v30 = vpop.eup %229  ;;  %v97_v31 = vadd.f32 1e-05, %v95_v29 }
 0x10a   :  { %v99_v32 = vmul.f32 %v230_v30, %v96_v27  ;;  %vm105_vm2 = vweird.f32 %v230_v30 }
 0x10b   :  { %231 = vrsqrt.f32 %v97_v31  ;;  %vm106_vm4 = vmor %vm104_vm3, %vm105_vm2  ;;  %vm114_vm6 = vweird.f32 %v97_v31 }
 0x10c   :  { %v100_v33 = vmul.f32 %v230_v30, %v99_v32 }
 0x10e   :  { %v101_v34 = vmul.f32 0.5, %v100_v33 }
 0x110   :  { %v102_v35 = vsub.f32 1.5, %v101_v34 }
 0x111   :  { %v232_v36 = vpop.eup %231 }
 0x112   :  { %v103_v37 = vmul.f32 %v230_v30, %v102_v35  ;;  %v109_v38 = vmul.f32 %v232_v36, %v97_v31  ;;  %vm115_vm5 = vweird.f32 %v232_v36 }
 0x113   :  { %vm116_vm7 = vmor %vm114_vm6, %vm115_vm5 }
 0x114   :  { %v107_v40 = vsel %vm106_vm4, %v230_v30, %v103_v37  ;;  %v110_v41 = vmul.f32 %v232_v36, %v109_v38 }
 0x115   :  { %v118_v42 = vmul.f32 %v107_v40, %v84_v13 }
 0x116   :  { %v111_v44 = vmul.f32 0.5, %v110_v41 }
 0x117   :  { %v124_v45 = vmul.f32 %v224_v39, %v118_v42 }
 0x118   :  { %v112_v46 = vsub.f32 1.5, %v111_v44 }
 0x119   :  { %v130_v47 = vadd.f32 %v225_v43, %v124_v45 }
 0x11a   :  { %v113_v48 = vmul.f32 %v232_v36, %v112_v46 }
 0x11b   :  { %211 = vmatmul.msk.f32.vlgmr.msra.gmra.mxu0 %vm68_vm0, %v130_v47 }
 0x11c   :  { %v117_v49 = vsel %vm116_vm7, %v232_v36, %v113_v48 }
 0x11d   :  { %v119_v50 = vmul.f32 %v117_v49, %v85_v18 }
 0x11f   :  { %v125_v51 = vmul.f32 %v224_v39, %v119_v50 }
 0x121   :  { %v131_v52 = vadd.f32 %v225_v43, %v125_v51 }
 0x123   :  { %212 = vmatmul.msk.f32.vlgmr.msra.gmra.mxu1 %vm68_vm0, %v131_v52 }
 0x198   :  { %v163_v54 = vpop.f32.mrf.mxu0 }
 0x199   :  { %v164_v55 = vadd.f32 %v226_v53, %v163_v54 }
 0x19b   :  { %v169_v56 = vmul.f32 %v164_v55, %v164_v55 }
 0x19d   :  { %v171_v57 = vmul.f32 %v169_v56, %v164_v55 }
 0x19f   :  { %v173_v58 = vmul.f32 0.044715, %v171_v57 }
 0x1a0   :  { %v166_v59 = vpop.f32.mrf.mxu1 }
 0x1a1   :  { %v175_v60 = vadd.f32 %v173_v58, %v164_v55  ;;  %v167_v61 = vadd.f32 %v226_v53, %v166_v59 }
 0x1a3   :  { %v177_v62 = vmul.f32 0.7978846, %v175_v60  ;;  %v170_v63 = vmul.f32 %v167_v61, %v167_v61 }
 0x1a5   :  { %233 = vtanh.f32 %v177_v62  ;;  %v172_v1 = vmul.f32 %v170_v63, %v167_v61 }
 0x1a7   :  { %v174_v3 = vmul.f32 0.044715, %v172_v1 }
 0x1a9   :  { %v176_v4 = vadd.f32 %v174_v3, %v167_v61 }
 0x1ab   :  { %v234_v5 = vpop.eup %233  ;;  %v178_v6 = vmul.f32 0.7978846, %v176_v4 }
 0x1ac   :  { %v181_v7 = vadd.f32 1.0, %v234_v5 }
 0x1ad   :  { %235 = vtanh.f32 %v178_v6 }
 0x1ae   :  { %v183_v8 = vmul.f32 0.5, %v181_v7 }
 0x1b0   :  { %v185_v9 = vmul.f32 %v183_v8, %v164_v55 }
 0x1b2   :  { %v187_v10 = vadd.f32 %v185_v9, %v391_v0 }
 0x1b3   :  { %v236_v11 = vpop.eup %235 }
 0x1b4   :  { %v182_v12 = vadd.f32 1.0, %v236_v11  ;;  %189 = vst.msk [vmem:[#allocation8] sm:$0xff] %vm68_vm0, %v187_v10 }
 0x1b6   :  { %v184_v13 = vmul.f32 0.5, %v182_v12 }
 0x1b8   :  { %v186_v14 = vmul.f32 %v184_v13, %v167_v61 }
 0x1ba   :  { %v188_v15 = vadd.f32 %v186_v14, %v395_v2 }
 0x1bc   :  { %190 = vst.msk [vmem:[#allocation8 + $0x8] sm:$0xff] %vm68_vm0, %v188_v15 }
 0x1bd   :  { %203 = dma.vmem_to_hbm [thread:$0]  %s196_s4, 256, %s198_s13, [#allocation4], %s341_s28, %s341_s28, %s342_s29  }
 0x1be   :  { %337 = dma.done.wait [#allocation4], 256  }
 0x1bf   :  { %338 = vsyncadd [#allocation4], 4294967040 }
 0x1c0   :  { %208 = vsyncpa [#allocation3], 1 }
 0x1c1   :  { %209 = vsyncpa [#allocation6], 1 }
 0x1c2   :  { %210 = vsyncpa [#allocation4], 1 }

</bundles_post_ra>
